<compile_context>
chip_gen: v7x
topology: tpu7x:2x2x1
jax: 0.10.0
libtpu: 0.0.40
codegen_flags: <defaults>
</compile_context>

<pallas_src>
import functools
import math

import jax
import jax.numpy as jnp
from jax.experimental import pallas as pl
from jax.experimental.pallas import tpu as pltpu


# --------------------------------------------------------------------------
# Hardware-aware helpers (all trace-time Python; no effect on semantics).
# --------------------------------------------------------------------------
def _device_kind() -> str:
    try:
        return jax.devices()[0].device_kind.lower()
    except Exception:  # pragma: no cover - defensive
        return ""


def _target_tile_bytes() -> int:
    kind = _device_kind()
    if "v5" in kind:
        # v5e default scoped VMEM is 16 MiB: keep ~2 MiB tiles
        # (2 in + 2 out buffers ~= 8 MiB).
        return 2 * 1024 * 1024
    if "v6" in kind or "v7" in kind or "7x" in kind:
        # 32 MiB scoped VMEM default: ~4 MiB tiles double-buffered ~= 16-17 MiB.
        # Bigger tiles matter most on v7x where per-step DMA time is short.
        return 4 * 1024 * 1024
    return 2 * 1024 * 1024  # unknown chip: conservative


def _pick_compute_dtype(x_dtype):
    x_dtype = jnp.dtype(x_dtype)
    if x_dtype == jnp.dtype(jnp.float32):
        return jnp.float32
    if x_dtype == jnp.dtype(jnp.bfloat16) and "v5" not in _device_kind():
        # v6e/v7x have a bf16 VALU: multiply natively (halves vreg pressure).
        return jnp.bfloat16
    return jnp.float32


def _choose_blocks(B, N, itemsize, target_bytes):
    """Pick (bs, tn) block dims for the (B, N) activation view."""
    sub = {4: 8, 2: 16, 1: 32}.get(itemsize, 8)   # dtype-native sublane count
    target_elems = max(target_bytes // itemsize, sub * 128)

    bs_min = B if B < sub else sub

    # Feature (lane) axis: full axis, or a lane-dense multiple of 128.
    tn_budget = max(target_elems // bs_min, 128)
    if N <= tn_budget:
        tn = N
    else:
        tn = (tn_budget // 128) * 128

    # Batch (sublane) axis: full axis, or a multiple of the sublane count.
    bs_budget = max(target_elems // tn, 1)
    if B < sub or bs_budget >= B:
        bs = B
    else:
        bs = min(B, max(sub, (bs_budget // sub) * sub))

    # Avoid a degenerate (1, 1) grid for non-tiny inputs: with a single step
    # there is no double-buffering and only one TensorCore gets work on v7x.
    total_bytes = B * N * itemsize
    if total_bytes > (1 << 20) and pl.cdiv(B, bs) * pl.cdiv(N, tn) == 1:
        if N > 128:
            half = -(-N // 2)
            tn_half = max(128, -(-half // 128) * 128)
            if tn_half < N:
                tn = tn_half
        if pl.cdiv(B, bs) * pl.cdiv(N, tn) == 1 and B > sub:
            bs = max(sub, ((-(-B // 2)) // sub) * sub)

    return bs, tn


# --------------------------------------------------------------------------
# Kernel
# --------------------------------------------------------------------------
def _drop_path_kernel(scale_ref, x_ref, o_ref, *, compute_dtype):
    # scale_ref: (bs, 1)  per-sample scale: 0.0 (dropped) or 1/keep_prob (kept).
    # x_ref/o_ref: (bs, tn) lane-dense activation tiles.
    x = x_ref[...].astype(compute_dtype)
    s = scale_ref[...].astype(compute_dtype)          # broadcast over lanes
    o_ref[...] = (x * s).astype(o_ref.dtype)


# --------------------------------------------------------------------------
# Wrapper
# --------------------------------------------------------------------------
def drop_path(x, key, drop_prob: float = 0.0, training: bool = False,
              *, donate: bool = False):
    """JAX/Pallas equivalent of the PyTorch `drop_path` function."""
    if drop_prob == 0.0 or not training:
        return x
    keep_prob = 1.0 - drop_prob

    B = x.shape[0]
    N = math.prod(x.shape[1:])
    if B == 0 or N == 0:
        return x

    # Per-sample keep mask + rescale: a tiny (B,) computation done once in the
    # wrapper so the kernel hot loop is a single broadcast multiply.
    # floor(keep_prob + U[0,1)) == 1 with probability keep_prob, else 0.
    u = jax.random.uniform(key, (B,), dtype=jnp.float32)
    mask = jnp.floor(keep_prob + u)
    scale = mask / keep_prob                          # 0 or 1/keep_prob

    compute_dtype = _pick_compute_dtype(x.dtype)
    scale2 = scale.astype(compute_dtype).reshape(B, 1)

    itemsize = jnp.dtype(x.dtype).itemsize
    bs, tn = _choose_blocks(B, N, itemsize, _target_tile_bytes())
    grid = (pl.cdiv(B, bs), pl.cdiv(N, tn))

    # Free view of the contiguous activation — no pad, no copy, no slice back.
    x2 = x.reshape(B, N)

    kernel = functools.partial(_drop_path_kernel, compute_dtype=compute_dtype)

    out2 = pl.pallas_call(
        kernel,
        out_shape=jax.ShapeDtypeStruct((B, N), x.dtype),
        grid=grid,
        in_specs=[
            # Per-sample scale column (tiny, revisited across feature blocks).
            pl.BlockSpec((bs, 1), lambda i, j: (i, 0)),
            # Activation tile; ragged edge blocks handled by masked edge stores.
            pl.BlockSpec((bs, tn), lambda i, j: (i, j)),
        ],
        out_specs=pl.BlockSpec((bs, tn), lambda i, j: (i, j)),
        compiler_params=pltpu.CompilerParams(
            dimension_semantics=("parallel", "parallel"),
        ),
        # When the caller can donate x, reuse its HBM buffer for the output.
        input_output_aliases=({1: 0} if donate else {}),
    )(scale2, x2)

    return out2.reshape(x.shape)


class DropPath:
    """Mirror of the PyTorch DropPath module (no parameters)."""

    def __init__(self, drop_prob: float = 0.0):
        self.drop_prob = drop_prob
        self.training = True

    def __call__(self, x, key):
        return drop_path(x, key, self.drop_prob, self.training)


if __name__ == "__main__":
    key = jax.random.PRNGKey(0)
    k_x, k_mask = jax.random.split(key)

    B, C, H, W = 2, 4, 16, 16
    x = jax.random.normal(k_x, (B, C, H, W), dtype=jnp.float32)

    drop_prob = 0.25
    module = DropPath(drop_prob)
    module.training = True

    out = jax.block_until_ready(module(x, k_mask))
    assert out.shape == x.shape and out.dtype == x.dtype

    # Pure-JAX reference for correctness check (same uniform draws).
    keep_prob = 1.0 - drop_prob
    u = jax.random.uniform(k_mask, (B,), dtype=jnp.float32)
    mask = jnp.floor(keep_prob + u).reshape(B, 1, 1, 1)
    ref = x / keep_prob * mask
    assert jnp.allclose(out, ref, atol=1e-6, rtol=1e-5), float(jnp.max(jnp.abs(out - ref)))

    # Non-divisible / ragged-edge path (B not a multiple of 8, odd feature size).
    x_rag = jax.random.normal(k_x, (3, 5, 7, 9), dtype=jnp.float32)
    out_rag = jax.block_until_ready(drop_path(x_rag, k_mask, drop_prob, True))
    u3 = jax.random.uniform(k_mask, (3,), dtype=jnp.float32)
    mask3 = jnp.floor(keep_prob + u3).reshape(3, 1, 1, 1)
    ref_rag = x_rag / keep_prob * mask3
    assert jnp.allclose(out_rag, ref_rag, atol=1e-6, rtol=1e-5)

    # Eval / drop_prob == 0 path returns x unchanged (no kernel launch).
    module.training = False
    out_eval = jax.block_until_ready(module(x, k_mask))
    assert jnp.array_equal(out_eval, x)

    print("KERNEL_OK")
</pallas_src>

<mosaic_0001>
module attributes {stable_mosaic.version = 11 : i64} {
  func.func @_drop_path_kernel(%arg0: i32, %arg1: i32, %arg2: memref<2x1xf32, #tpu.memory_space<vmem>>, %arg3: memref<2x1024xf32, #tpu.memory_space<vmem>>, %arg4: memref<2x1024xf32, #tpu.memory_space<vmem>>) attributes {dimension_semantics = [#tpu.dimension_semantics<parallel>, #tpu.dimension_semantics<parallel>], iteration_bounds = array<i64: 1, 1>, scalar_prefetch = 0 : i64, scratch_operands = 0 : i64, tpu.core_type = #tpu.core_type<tc>, window_params = [{transform_indices = @transform_0, window_bounds = array<i64: 2, 1>}, {transform_indices = @transform_1, window_bounds = array<i64: 2, 1024>}, {transform_indices = @transform_2, window_bounds = array<i64: 2, 1024>}]} {
    %c0 = arith.constant 0 : index
    %c0_0 = arith.constant 0 : index
    %0 = vector.load %arg3[%c0, %c0_0] : memref<2x1024xf32, #tpu.memory_space<vmem>>, vector<2x1024xf32>
    %c0_1 = arith.constant 0 : index
    %c0_2 = arith.constant 0 : index
    %1 = vector.load %arg2[%c0_1, %c0_2] : memref<2x1xf32, #tpu.memory_space<vmem>>, vector<2x1xf32>
    %2 = vector.broadcast %1 : vector<2x1xf32> to vector<2x1024xf32>
    %3 = arith.mulf %0, %2 : vector<2x1024xf32>
    %c0_3 = arith.constant 0 : index
    %c0_4 = arith.constant 0 : index
    %4 = vector.load %arg4[%c0_3, %c0_4] : memref<2x1024xf32, #tpu.memory_space<vmem>>, vector<2x1024xf32>
    tpu.vector_store %arg4[%c0_3, %c0_4], %3 {strides = array<i32>} : memref<2x1024xf32, #tpu.memory_space<vmem>>, vector<2x1024xf32>,
    return
  }
  func.func @transform_0(%arg0: i32, %arg1: i32) -> (i32, i32) {
    %c0_i32 = arith.constant 0 : i32
    %c0_i32_0 = arith.constant 0 : i32
    return %arg0, %c0_i32 : i32, i32
  }
  func.func @transform_1(%arg0: i32, %arg1: i32) -> (i32, i32) {
    %c0_i32 = arith.constant 0 : i32
    return %arg0, %arg1 : i32, i32
  }
  func.func @transform_2(%arg0: i32, %arg1: i32) -> (i32, i32) {
    %c0_i32 = arith.constant 0 : i32
    return %arg0, %arg1 : i32, i32
  }
}

</mosaic_0001>

<bundles_post_ra>
// kernel: tpu_custom_call.1
= control target key start
LH: loop header
LB: loop body
LE: loop exit
PB: predicated region body
PF: predicated region fallthrough
CT: control target
= control target key end

     0   :  { %7 = vsyncpa [#allocation3], 0  ;;  %s157_s0 = inlined_call_operand.vmem [shape: f32[2,1], index: 0, kind: input, shape index: {}]   ;;  %s158_s1 = inlined_call_operand.hbm [shape: f32[2,1024], index: 1, kind: input, shape index: {}]   ;;  %s159_s2 = inlined_call_operand.hbm [shape: f32[2,1024], index: 2, kind: output, shape index: {}]  }
   0x1   :  { %8 = vsyncpa [#allocation4], 0  ;;  %s111_s9 = smov [#allocation2]   ;;  %s63_s13 = scalar_lea.hbm %s158_s1, 256 }
   0x2   :  { %s17_s10 = sshll.u32 %s111_s9, 4  ;;  %p64_p0 = scmp.ne.s32.totalorder %s158_s1, %s63_s13  ;;  %s18_s10 = int_to_ptr.vmem [resolvable:$true] %s17_s10 }
   0x3   :  { %p67_p1 = scmp.lt.u32.totalorder %s63_s13, %s158_s1 }
   0x5   :  { %p69_p2 = pnand %p67_p1, %p64_p0 }
   0x7   :  { %72 = shalt.err (!%p69_p2)
}
   0x8   :  { %s73_s18 = scalar_lea.vmem %s18_s10, 256  ;;  %p78_p4 = scmp.lt.s32.totalorder %s18_s10, %s18_s10 }
   0x9   :  { %p74_p3 = scmp.ne.s32.totalorder %s18_s10, %s73_s18  ;;  %p79_p5 = scmp.lt.s32.totalorder %s73_s18, %s73_s18 }
   0xb   :  { %p80_p6 = por %p79_p5, %p78_p4 }
   0xd   :  { %p81_p7 = pnand %p80_p6, %p74_p3 }
   0xf   :  { %84 = shalt.err (!%p81_p7)
}
  0x10   :  { %20 = dma.hbm_to_vmem [thread:$0]  %s158_s1, 256, %s18_s10, [#allocation3]  }
  0x11   :  { %107 = dma.done.wait [#allocation3], 256  }
  0x12   :  { %108 = vsyncadd [#allocation3], 4294967040  ;;  %v112_v0 = vmov 0   ;;  %v26_v1 = vld [vmem:[%s157_s0] sm:$0x3]  ;;  %v34_v4 = vlaneseq  ;;  %v25_v10 = vld [vmem:[#allocation2 + $0x8] sm:$0xff] }
  0x13   :  { %62 = vset.pattern.permute.xlu0 %v112_v0  ;;  %v113_v2 = vmov 269488144   ;;  %v24_v9 = vld [vmem:[#allocation2] sm:$0xff]  ;;  %s114_s23 = smov [#allocation5]  }
  0x14   :  { %29 = vperm.xlu0 %62, %v26_v1   ;;  %v32_v3 = vunpack.c.l.s4 %v113_v2  ;;  %v35_v6 = vshrl.u32 %v34_v4, 7  ;;  %s49_s1 = sshll.u32 %s114_s23, 4  ;;  %s50_s1 = int_to_ptr.vmem [resolvable:$true] %s49_s1 }
  0x15   :  { %s85_s24 = scalar_lea.vmem %s50_s1, 256  ;;  %p90_p9 = scmp.lt.s32.totalorder %s50_s1, %s50_s1 }
  0x16   :  { %v33_v5 = vunpack.c.0.s8 %v32_v3  ;;  %p86_p8 = scmp.ne.s32.totalorder %s50_s1, %s85_s24  ;;  %p91_p10 = scmp.lt.s32.totalorder %s85_s24, %s85_s24 }
  0x18   :  { %v36_v7 = vsub.s32 %v33_v5, %v35_v6  ;;  %p92_p11 = por %p91_p10, %p90_p9 }
  0x1a   :  { %p93_p12 = pnand %p92_p11, %p86_p8 }
  0x93   :  { %v30_v8 = vpop.permute.xlu0 %29 }
  0x94   :  { %v37_v11 = vrot.slane %v30_v8, %v36_v7 }
  0x96   :  { %v39_v12 = vmul.f32 %v37_v11, %v24_v9  ;;  %v40_v13 = vmul.f32 %v37_v11, %v25_v10 }
  0x98   :  { %41 = vst [vmem:[#allocation5] sm:$0xff] %v39_v12  ;;  %42 = vst [vmem:[#allocation5 + $0x8] sm:$0xff] %v40_v13 }
  0x99   :  { %96 = shalt.err (!%p93_p12)
}
  0x9a   :  { %s97_s26 = scalar_lea.hbm %s159_s2, 256 }
  0x9b   :  { %p98_p13 = scmp.ne.s32.totalorder %s159_s2, %s97_s26  ;;  %p101_p0 = scmp.lt.u32.totalorder %s97_s26, %s159_s2 }
  0x9d   :  { %p103_p1 = pnand %p101_p0, %p98_p13 }
  0x9f   :  { %106 = shalt.err (!%p103_p1)
}
  0xa0   :  { %52 = dma.vmem_to_hbm [thread:$0]  %s50_s1, 256, %s159_s2, [#allocation4]  }
  0xa1   :  { %109 = dma.done.wait [#allocation4], 256  }
  0xa2   :  { %110 = vsyncadd [#allocation4], 4294967040 }
  0xa3   :  { %56 = vsyncpa [#allocation3], 1 }
  0xa4   :  { %57 = vsyncpa [#allocation4], 1 }

</bundles_post_ra>
